<compile_context>
chip_gen: v5e
topology: v5e:2x2
jax: 0.10.0
libtpu: 0.0.40
codegen_flags: <defaults>
</compile_context>

<pallas_src>
import functools

import jax
import jax.numpy as jnp
from jax.experimental import pallas as pl
from jax.experimental.pallas import tpu as pltpu


def _periodic_pad_kernel(x_ref, o_ref, *, pad):
    # x_ref: (BC, H, W) ; o_ref: (BC, H + 2*pad, W + 2*pad)
    bc, H, W = x_ref.shape
    Wo = W + 2 * pad

    x = x_ref[...]

    # Middle rows: three direct region stores (center + wrap strips) instead of
    # materializing a concatenated (BC, H, Wo) intermediate in VMEM.
    o_ref[:, pad:pad + H, pad:pad + W] = x
    o_ref[:, pad:pad + H, 0:pad] = x[:, :, W - pad:]
    o_ref[:, pad:pad + H, pad + W:pad + W + pad] = x[:, :, 0:pad]

    # Top / bottom zero bands only (center is written exactly once above).
    zero_band = jnp.zeros((bc, pad, Wo), dtype=o_ref.dtype)
    o_ref[:, 0:pad, :] = zero_band
    o_ref[:, pad + H:pad + H + pad, :] = zero_band


def _tpu_memory_info():
    """(physical VMEM bytes, TensorCores per device) with safe fallbacks."""
    vmem_bytes = 128 * 1024 * 1024
    try:
        info = pltpu.get_tpu_info()
        vmem_bytes = int(getattr(info, "vmem_capacity_bytes", vmem_bytes))
    except Exception:
        pass
    num_cores = 1
    try:
        num_cores = max(1, int(getattr(jax.devices()[0], "num_cores", 1)))
    except Exception:
        pass
    return vmem_bytes, num_cores


def _pick_block_channels(n_total, per_channel_bytes, budget_bytes, min_grid):
    """Largest BC whose double-buffered (in + out) blocks fit budget_bytes,
    keeping at least `min_grid` grid steps when possible (so the parallel grid
    axis can shard across multiple TensorCores). BC need not divide n_total."""
    bc = max(1, budget_bytes // (2 * max(1, per_channel_bytes)))
    if min_grid > 1 and n_total >= min_grid:
        bc = min(bc, max(1, n_total // min_grid))
    return int(min(bc, n_total))


def periodic_pad_2d(x, pad_width):
    """Pallas equivalent of PeriodicPad2d(pad_width)(x) for NCHW input."""
    N, C, H, W = x.shape

    if pad_width < 0 or pad_width > W:
        raise ValueError(
            f"pad_width must be in [0, W={W}], got {pad_width} "
            "(circular pad wider than the input is undefined).")
    if pad_width == 0:
        # Both pads are identity for pad_width == 0.
        return x

    Ho, Wo = H + 2 * pad_width, W + 2 * pad_width
    NC = N * C
    x_flat = x.reshape(NC, H, W)

    itemsize = jnp.dtype(x.dtype).itemsize
    per_channel_bytes = (H * W + Ho * Wo) * itemsize

    vmem_bytes, num_cores = _tpu_memory_info()
    # Block budget: double-buffered in+out blocks stay under ~45% of physical
    # VMEM (capped at 48 MiB), leaving room for compiler-internal scratch.
    budget_bytes = min(int(0.45 * vmem_bytes), 48 << 20)

    BC = _pick_block_channels(NC, per_channel_bytes, budget_bytes,
                              min_grid=num_cores)
    grid_len = int(pl.cdiv(NC, BC))
    # On multi-TensorCore parts keep the parallel axis an even multiple of the
    # core count so no core gets an extra tail block.
    if num_cores > 1 and grid_len > 1 and grid_len % num_cores != 0:
        grid_len = int(pl.cdiv(grid_len, num_cores)) * num_cores
        BC = int(pl.cdiv(NC, grid_len))
        grid_len = int(pl.cdiv(NC, BC))

    # Explicit scoped-VMEM limit sized to the actual double-buffered footprint
    # (+ headroom), kept safely under physical VMEM (v7x: 64 MiB per TC).
    footprint = 2 * BC * per_channel_bytes
    vmem_limit = max(16 << 20, footprint + max(footprint // 4, 4 << 20))
    vmem_limit = int(min(vmem_limit, vmem_bytes - (8 << 20)))

    kernel = functools.partial(_periodic_pad_kernel, pad=pad_width)

    out_flat = pl.pallas_call(
        kernel,
        out_shape=jax.ShapeDtypeStruct((NC, Ho, Wo), x.dtype),
        grid=(grid_len,),
        in_specs=[pl.BlockSpec((BC, H, W), lambda i: (i, 0, 0))],
        out_specs=pl.BlockSpec((BC, Ho, Wo), lambda i: (i, 0, 0)),
        compiler_params=pltpu.CompilerParams(
            dimension_semantics=("parallel",),
            vmem_limit_bytes=vmem_limit),
        cost_estimate=pl.CostEstimate(
            flops=0, transcendentals=0,
            bytes_accessed=NC * per_channel_bytes),
    )(x_flat)

    return out_flat.reshape(N, C, Ho, Wo)


def _reference(x, pad_width):
    # circular pad on W, zero pad on H (matches torch F.pad semantics)
    out = jnp.pad(x, ((0, 0), (0, 0), (0, 0), (pad_width, pad_width)),
                  mode="wrap")
    out = jnp.pad(out, ((0, 0), (0, 0), (pad_width, pad_width), (0, 0)),
                  mode="constant", constant_values=0)
    return out


if __name__ == "__main__":
    key = jax.random.PRNGKey(0)
    N, C, H, W = 2, 4, 16, 16
    pad_width = 2  # module's __init__ parameter; deterministic choice

    x = jax.random.normal(key, (N, C, H, W), dtype=jnp.float32)

    out = periodic_pad_2d(x, pad_width)
    out = jax.block_until_ready(out)

    ref = _reference(x, pad_width)
    assert out.shape == (N, C, H + 2 * pad_width, W + 2 * pad_width)
    assert jnp.allclose(out, ref), "mismatch vs reference"

    print("KERNEL_OK")
</pallas_src>

<mosaic_0001>
module attributes {stable_mosaic.version = 11 : i64} {
  func.func @_periodic_pad_kernel(%arg0: i32, %arg1: memref<8x16x16xf32, #tpu.memory_space<vmem>>, %arg2: memref<8x20x20xf32, #tpu.memory_space<vmem>>) attributes {dimension_semantics = [#tpu.dimension_semantics<parallel>], iteration_bounds = array<i64: 1>, scalar_prefetch = 0 : i64, scratch_operands = 0 : i64, tpu.core_type = #tpu.core_type<tc>, window_params = [{transform_indices = @transform_0, window_bounds = array<i64: 8, 16, 16>}, {transform_indices = @transform_1, window_bounds = array<i64: 8, 20, 20>}]} {
    %c0 = arith.constant 0 : index
    %c0_0 = arith.constant 0 : index
    %c0_1 = arith.constant 0 : index
    %0 = vector.load %arg1[%c0, %c0_0, %c0_1] : memref<8x16x16xf32, #tpu.memory_space<vmem>>, vector<8x16x16xf32>
    %c0_2 = arith.constant 0 : index
    %c2 = arith.constant 2 : index
    %c2_3 = arith.constant 2 : index
    %1 = vector.load %arg2[%c0_2, %c2, %c2_3] : memref<8x20x20xf32, #tpu.memory_space<vmem>>, vector<8x16x16xf32>
    tpu.vector_store %arg2[%c0_2, %c2, %c2_3], %0 {strides = array<i32>} : memref<8x20x20xf32, #tpu.memory_space<vmem>>, vector<8x16x16xf32>,
    %2 = vector.extract_strided_slice %0 {offsets = [0, 0, 14], sizes = [8, 16, 2], strides = [1, 1, 1]} : vector<8x16x16xf32> to vector<8x16x2xf32>
    %c0_4 = arith.constant 0 : index
    %c2_5 = arith.constant 2 : index
    %c0_6 = arith.constant 0 : index
    %3 = vector.load %arg2[%c0_4, %c2_5, %c0_6] : memref<8x20x20xf32, #tpu.memory_space<vmem>>, vector<8x16x2xf32>
    tpu.vector_store %arg2[%c0_4, %c2_5, %c0_6], %2 {strides = array<i32>} : memref<8x20x20xf32, #tpu.memory_space<vmem>>, vector<8x16x2xf32>,
    %4 = vector.extract_strided_slice %0 {offsets = [0, 0, 0], sizes = [8, 16, 2], strides = [1, 1, 1]} : vector<8x16x16xf32> to vector<8x16x2xf32>
    %c0_7 = arith.constant 0 : index
    %c2_8 = arith.constant 2 : index
    %c18 = arith.constant 18 : index
    %5 = vector.load %arg2[%c0_7, %c2_8, %c18] : memref<8x20x20xf32, #tpu.memory_space<vmem>>, vector<8x16x2xf32>
    tpu.vector_store %arg2[%c0_7, %c2_8, %c18], %4 {strides = array<i32>} : memref<8x20x20xf32, #tpu.memory_space<vmem>>, vector<8x16x2xf32>,
    %cst = arith.constant 0.000000e+00 : f32
    %6 = vector.broadcast %cst : f32 to vector<8x2x20xf32>
    %c0_9 = arith.constant 0 : index
    %c0_10 = arith.constant 0 : index
    %c0_11 = arith.constant 0 : index
    %7 = vector.load %arg2[%c0_9, %c0_10, %c0_11] : memref<8x20x20xf32, #tpu.memory_space<vmem>>, vector<8x2x20xf32>
    tpu.vector_store %arg2[%c0_9, %c0_10, %c0_11], %6 {strides = array<i32>} : memref<8x20x20xf32, #tpu.memory_space<vmem>>, vector<8x2x20xf32>,
    %c0_12 = arith.constant 0 : index
    %c18_13 = arith.constant 18 : index
    %c0_14 = arith.constant 0 : index
    %8 = vector.load %arg2[%c0_12, %c18_13, %c0_14] : memref<8x20x20xf32, #tpu.memory_space<vmem>>, vector<8x2x20xf32>
    tpu.vector_store %arg2[%c0_12, %c18_13, %c0_14], %6 {strides = array<i32>} : memref<8x20x20xf32, #tpu.memory_space<vmem>>, vector<8x2x20xf32>,
    return
  }
  func.func @transform_0(%arg0: i32) -> (i32, i32, i32) {
    %c0_i32 = arith.constant 0 : i32
    %c0_i32_0 = arith.constant 0 : i32
    %c0_i32_1 = arith.constant 0 : i32
    return %arg0, %c0_i32, %c0_i32_0 : i32, i32, i32
  }
  func.func @transform_1(%arg0: i32) -> (i32, i32, i32) {
    %c0_i32 = arith.constant 0 : i32
    %c0_i32_0 = arith.constant 0 : i32
    %c0_i32_1 = arith.constant 0 : i32
    return %arg0, %c0_i32, %c0_i32_0 : i32, i32, i32
  }
}

</mosaic_0001>

<bundles_post_ra>
// kernel: tpu_custom_call.1
= control target key start
LH: loop header
LB: loop body
LE: loop exit
PB: predicated region body
PF: predicated region fallthrough
CT: control target
= control target key end

     0   :  { %6 = vsyncpa [#allocation3], 0  ;;  %s306_s9 = smov [#allocation2]   ;;  %s307_s11 = smov 128   ;;  %s614_s0 = inlined_call_operand.hbm [shape: f32[8,16,16], index: 0, kind: input, shape index: {}]   ;;  %s615_s1 = inlined_call_operand.vmem [shape: f32[8,20,20], index: 1, kind: output, shape index: {}]  }
   0x1   :  { %s11_s8 = sshll.u32 %s614_s0, 4  ;;  %s13_s10 = sshll.u32 %s306_s9, 4  ;;  %s12_s8 = int_to_ptr.hbm [resolvable:$true] %s11_s8  ;;  %s14_s10 = int_to_ptr.vmem [resolvable:$true] %s13_s10 }
   0x2   :  { %s308_s12 = smov 8  }
   0x3   :  { %19 = dma.hbm_to_vmem [thread:$0]  %s12_s8, 2048, %s14_s10, [#allocation3], %s307_s11, %s307_s11, %s308_s12  }
   0x4   :  { %304 = dma.done.wait [#allocation3], 2048  }
   0x5   :  { %305 = vsyncadd [#allocation3], 4294965248  ;;  %vm251_vm0 = vcmask 156672   ;;  %v309_v0 = vmov 0.0   ;;  %v26_v1 = vld [vmem:[#allocation2 + $0x10] sm:$0xff]  ;;  %v24_v2 = vld [vmem:[#allocation2] sm:$0xff] }
   0x6   :  { %252 = vst.msk [vmem:[%s615_s1] sm:$0x3] %vm251_vm0, %v309_v0  ;;  %s310_s28 = smov 2   ;;  %v28_v3 = vld [vmem:[#allocation2 + $0x20] sm:$0xff]  ;;  %v27_v4 = vld [vmem:[#allocation2 + $0x18] sm:$0xff]  ;;  %v25_v5 = vld [vmem:[#allocation2 + $0x8] sm:$0xff] }
   0x7   :  { %253 = vst.msk [vmem:[%s615_s1 + $0x18] sm:$0x3] %vm251_vm0, %v309_v0  ;;  %60 = vrot.lane.b32.xlu1 %v26_v1, %s310_s28  ;;  %56 = vrot.lane.b32.xlu0 %v24_v2, %s310_s28  ;;  %v29_v6 = vld [vmem:[#allocation2 + $0x28] sm:$0xff]  ;;  %v31_v7 = vld [vmem:[#allocation2 + $0x38] sm:$0xff]  ;;  %v30_v8 = vld [vmem:[#allocation2 + $0x30] sm:$0xff]  ;;  %s311_s16 = smov 114  }
   0x8   :  { %254 = vst.msk [vmem:[%s615_s1 + $0x30] sm:$0x3] %vm251_vm0, %v309_v0  ;;  %64 = vrot.lane.b32.xlu2 %v28_v3, %s310_s28  ;;  %v32_v9 = vld [vmem:[#allocation2 + $0x40] sm:$0xff]  ;;  %v34_v10 = vld [vmem:[#allocation2 + $0x50] sm:$0xff]  ;;  %v33_v11 = vld [vmem:[#allocation2 + $0x48] sm:$0xff]  ;;  %s312_s0 = smov 18  }
   0x9   :  { %255 = vst.msk [vmem:[%s615_s1 + $0x48] sm:$0x3] %vm251_vm0, %v309_v0  ;;  %v35_v12 = vld [vmem:[#allocation2 + $0x58] sm:$0xff]  ;;  %v37_v13 = vld [vmem:[#allocation2 + $0x68] sm:$0xff]  ;;  %v36_v14 = vld [vmem:[#allocation2 + $0x60] sm:$0xff]  ;;  %vm104_vm1 = vcmask 146448  }
   0xa   :  { %256 = vst.msk [vmem:[%s615_s1 + $0x60] sm:$0x3] %vm251_vm0, %v309_v0  ;;  %v38_v15 = vld [vmem:[#allocation2 + $0x70] sm:$0xff]  ;;  %v39_v16 = vld [vmem:[#allocation2 + $0x78] sm:$0xff]  ;;  %vm169_vm2 = vcmask 15360   ;;  %vm234_vm3 = vcmask 162960  }
   0xb   :  { %257 = vst.msk [vmem:[%s615_s1 + $0x78] sm:$0x3] %vm251_vm0, %v309_v0 }
   0xc   :  { %258 = vst.msk [vmem:[%s615_s1 + $0x90] sm:$0x3] %vm251_vm0, %v309_v0 }
   0xd   :  { %259 = vst.msk [vmem:[%s615_s1 + $0xa8] sm:$0x3] %vm251_vm0, %v309_v0 }
   0xe   :  { %260 = vst.msk [vmem:[%s615_s1 + $0x12] sm:$0x3] %vm251_vm0, %v309_v0 }
   0xf   :  { %261 = vst.msk [vmem:[%s615_s1 + $0x2a] sm:$0x3] %vm251_vm0, %v309_v0  ;;  %62 = vrot.lane.b32.xlu1 %v27_v4, %s310_s28  ;;  %58 = vrot.lane.b32.xlu0 %v25_v5, %s310_s28 }
  0x10   :  { %262 = vst.msk [vmem:[%s615_s1 + $0x42] sm:$0x3] %vm251_vm0, %v309_v0  ;;  %66 = vrot.lane.b32.xlu2 %v29_v6, %s310_s28 }
  0x11   :  { %263 = vst.msk [vmem:[%s615_s1 + $0x5a] sm:$0x3] %vm251_vm0, %v309_v0 }
  0x12   :  { %264 = vst.msk [vmem:[%s615_s1 + $0x72] sm:$0x3] %vm251_vm0, %v309_v0 }
  0x13   :  { %265 = vst.msk [vmem:[%s615_s1 + $0x8a] sm:$0x3] %vm251_vm0, %v309_v0 }
  0x14   :  { %266 = vst.msk [vmem:[%s615_s1 + $0xa2] sm:$0x3] %vm251_vm0, %v309_v0 }
  0x15   :  { %267 = vst.msk [vmem:[%s615_s1 + $0xba] sm:$0x3] %vm251_vm0, %v309_v0 }
  0x17   :  { %70 = vrot.lane.b32.xlu1 %v31_v7, %s310_s28  ;;  %68 = vrot.lane.b32.xlu0 %v30_v8, %s310_s28 }
  0x18   :  { %72 = vrot.lane.b32.xlu2 %v32_v9, %s310_s28 }
  0x1f   :  { %76 = vrot.lane.b32.xlu1 %v34_v10, %s310_s28  ;;  %74 = vrot.lane.b32.xlu0 %v33_v11, %s310_s28 }
  0x20   :  { %78 = vrot.lane.b32.xlu2 %v35_v12, %s310_s28 }
  0x27   :  { %82 = vrot.lane.b32.xlu1 %v37_v13, %s310_s28  ;;  %80 = vrot.lane.b32.xlu0 %v36_v14, %s310_s28 }
  0x28   :  { %84 = vrot.lane.b32.xlu2 %v38_v15, %s310_s28 }
  0x2f   :  { %121 = vrot.lane.b32.xlu1 %v24_v2, %s311_s16  ;;  %86 = vrot.lane.b32.xlu0 %v39_v16, %s310_s28 }
  0x30   :  { %123 = vrot.lane.b32.xlu2 %v25_v5, %s311_s16 }
  0x37   :  { %127 = vrot.lane.b32.xlu1 %v27_v4, %s311_s16  ;;  %125 = vrot.lane.b32.xlu0 %v26_v1, %s311_s16 }
  0x38   :  { %129 = vrot.lane.b32.xlu2 %v28_v3, %s311_s16 }
  0x3f   :  { %133 = vrot.lane.b32.xlu1 %v30_v8, %s311_s16  ;;  %131 = vrot.lane.b32.xlu0 %v29_v6, %s311_s16 }
  0x40   :  { %135 = vrot.lane.b32.xlu2 %v31_v7, %s311_s16 }
  0x47   :  { %139 = vrot.lane.b32.xlu1 %v33_v11, %s311_s16  ;;  %137 = vrot.lane.b32.xlu0 %v32_v9, %s311_s16 }
  0x48   :  { %141 = vrot.lane.b32.xlu2 %v34_v10, %s311_s16 }
  0x4f   :  { %145 = vrot.lane.b32.xlu1 %v36_v14, %s311_s16  ;;  %143 = vrot.lane.b32.xlu0 %v35_v12, %s311_s16 }
  0x50   :  { %147 = vrot.lane.b32.xlu2 %v37_v13, %s311_s16 }
  0x57   :  { %151 = vrot.lane.b32.xlu1 %v39_v16, %s311_s16  ;;  %149 = vrot.lane.b32.xlu0 %v38_v15, %s311_s16 }
  0x58   :  { %186 = vrot.lane.b32.xlu2 %v24_v2, %s312_s0 }
  0x5f   :  { %190 = vrot.lane.b32.xlu1 %v26_v1, %s312_s0  ;;  %188 = vrot.lane.b32.xlu0 %v25_v5, %s312_s0 }
  0x60   :  { %192 = vrot.lane.b32.xlu2 %v27_v4, %s312_s0 }
  0x62   :  { %v65_v17 = vpop.permute.xlu2 %64 }
  0x63   :  { %109 = vst.msk [vmem:[%s615_s1 + $0x32] sm:$0xff] %vm104_vm1, %v65_v17 }
  0x67   :  { %196 = vrot.lane.b32.xlu1 %v29_v6, %s312_s0  ;;  %194 = vrot.lane.b32.xlu0 %v28_v3, %s312_s0 }
  0x68   :  { %198 = vrot.lane.b32.xlu2 %v30_v8, %s312_s0 }
  0x6a   :  { %v67_v18 = vpop.permute.xlu2 %66 }
  0x6b   :  { %110 = vst.msk [vmem:[%s615_s1 + $0x3a] sm:$0xff] %vm104_vm1, %v67_v18 }
  0x6f   :  { %202 = vrot.lane.b32.xlu1 %v32_v9, %s312_s0  ;;  %200 = vrot.lane.b32.xlu0 %v31_v7, %s312_s0 }
  0x70   :  { %204 = vrot.lane.b32.xlu2 %v33_v11, %s312_s0 }
  0x72   :  { %v73_v19 = vpop.permute.xlu2 %72 }
  0x73   :  { %113 = vst.msk [vmem:[%s615_s1 + $0x62] sm:$0xff] %vm104_vm1, %v73_v19 }
  0x77   :  { %208 = vrot.lane.b32.xlu1 %v35_v12, %s312_s0  ;;  %206 = vrot.lane.b32.xlu0 %v34_v10, %s312_s0 }
  0x78   :  { %210 = vrot.lane.b32.xlu2 %v36_v14, %s312_s0 }
  0x79   :  { %v61_v20 = vpop.permute.xlu1 %60  ;;  %v57_v21 = vpop.permute.xlu0 %56 }
  0x7a   :  { %107 = vst.msk [vmem:[%s615_s1 + $0x1a] sm:$0xff] %vm104_vm1, %v61_v20  ;;  %v79_v22 = vpop.permute.xlu2 %78 }
  0x7b   :  { %105 = vst.msk [vmem:[%s615_s1 + $0x2] sm:$0xff] %vm104_vm1, %v57_v21 }
  0x7c   :  { %116 = vst.msk [vmem:[%s615_s1 + $0x82] sm:$0xff] %vm104_vm1, %v79_v22 }
  0x7f   :  { %214 = vrot.lane.b32.xlu1 %v38_v15, %s312_s0  ;;  %212 = vrot.lane.b32.xlu0 %v37_v13, %s312_s0 }
  0x80   :  { %216 = vrot.lane.b32.xlu2 %v39_v16, %s312_s0 }
  0x81   :  { %v63_v23 = vpop.permute.xlu1 %62  ;;  %v59_v24 = vpop.permute.xlu0 %58 }
  0x82   :  { %108 = vst.msk [vmem:[%s615_s1 + $0x22] sm:$0xff] %vm104_vm1, %v63_v23  ;;  %v85_v25 = vpop.permute.xlu2 %84 }
  0x83   :  { %106 = vst.msk [vmem:[%s615_s1 + $0xa] sm:$0xff] %vm104_vm1, %v59_v24 }
  0x84   :  { %119 = vst.msk [vmem:[%s615_s1 + $0xaa] sm:$0xff] %vm104_vm1, %v85_v25 }
  0x89   :  { %v71_v26 = vpop.permute.xlu1 %70  ;;  %v69_v27 = vpop.permute.xlu0 %68 }
  0x8a   :  { %112 = vst.msk [vmem:[%s615_s1 + $0x52] sm:$0xff] %vm104_vm1, %v71_v26  ;;  %v124_v28 = vpop.permute.xlu2 %123 }
  0x8b   :  { %111 = vst.msk [vmem:[%s615_s1 + $0x4a] sm:$0xff] %vm104_vm1, %v69_v27 }
  0x8c   :  { %171 = vst.msk [vmem:[%s615_s1 + $0xa] sm:$0xff] %vm169_vm2, %v124_v28 }
  0x91   :  { %v77_v29 = vpop.permute.xlu1 %76  ;;  %v75_v30 = vpop.permute.xlu0 %74 }
  0x92   :  { %115 = vst.msk [vmem:[%s615_s1 + $0x7a] sm:$0xff] %vm104_vm1, %v77_v29  ;;  %v130_v31 = vpop.permute.xlu2 %129 }
  0x93   :  { %114 = vst.msk [vmem:[%s615_s1 + $0x6a] sm:$0xff] %vm104_vm1, %v75_v30 }
  0x94   :  { %174 = vst.msk [vmem:[%s615_s1 + $0x32] sm:$0xff] %vm169_vm2, %v130_v31 }
  0x99   :  { %v83_v32 = vpop.permute.xlu1 %82  ;;  %v81_v33 = vpop.permute.xlu0 %80 }
  0x9a   :  { %118 = vst.msk [vmem:[%s615_s1 + $0x9a] sm:$0xff] %vm104_vm1, %v83_v32  ;;  %v136_v34 = vpop.permute.xlu2 %135 }
  0x9b   :  { %117 = vst.msk [vmem:[%s615_s1 + $0x92] sm:$0xff] %vm104_vm1, %v81_v33 }
  0x9c   :  { %177 = vst.msk [vmem:[%s615_s1 + $0x52] sm:$0xff] %vm169_vm2, %v136_v34 }
  0xa1   :  { %v122_v35 = vpop.permute.xlu1 %121  ;;  %v87_v36 = vpop.permute.xlu0 %86 }
  0xa2   :  { %170 = vst.msk [vmem:[%s615_s1 + $0x2] sm:$0xff] %vm169_vm2, %v122_v35  ;;  %v142_v37 = vpop.permute.xlu2 %141 }
  0xa3   :  { %120 = vst.msk [vmem:[%s615_s1 + $0xb2] sm:$0xff] %vm104_vm1, %v87_v36 }
  0xa4   :  { %180 = vst.msk [vmem:[%s615_s1 + $0x7a] sm:$0xff] %vm169_vm2, %v142_v37 }
  0xa9   :  { %v128_v38 = vpop.permute.xlu1 %127  ;;  %v126_v39 = vpop.permute.xlu0 %125 }
  0xaa   :  { %173 = vst.msk [vmem:[%s615_s1 + $0x22] sm:$0xff] %vm169_vm2, %v128_v38  ;;  %v148_v40 = vpop.permute.xlu2 %147 }
  0xab   :  { %172 = vst.msk [vmem:[%s615_s1 + $0x1a] sm:$0xff] %vm169_vm2, %v126_v39 }
  0xac   :  { %183 = vst.msk [vmem:[%s615_s1 + $0x9a] sm:$0xff] %vm169_vm2, %v148_v40 }
  0xb1   :  { %v134_v41 = vpop.permute.xlu1 %133  ;;  %v132_v42 = vpop.permute.xlu0 %131 }
  0xb2   :  { %176 = vst.msk [vmem:[%s615_s1 + $0x4a] sm:$0xff] %vm169_vm2, %v134_v41  ;;  %v187_v43 = vpop.permute.xlu2 %186 }
  0xb3   :  { %175 = vst.msk [vmem:[%s615_s1 + $0x3a] sm:$0xff] %vm169_vm2, %v132_v42 }
  0xb4   :  { %235 = vst.msk [vmem:[%s615_s1 + $0x2] sm:$0xff] %vm234_vm3, %v187_v43 }
  0xb9   :  { %v140_v44 = vpop.permute.xlu1 %139  ;;  %v138_v45 = vpop.permute.xlu0 %137 }
  0xba   :  { %179 = vst.msk [vmem:[%s615_s1 + $0x6a] sm:$0xff] %vm169_vm2, %v140_v44  ;;  %v193_v46 = vpop.permute.xlu2 %192 }
  0xbb   :  { %178 = vst.msk [vmem:[%s615_s1 + $0x62] sm:$0xff] %vm169_vm2, %v138_v45 }
  0xbc   :  { %238 = vst.msk [vmem:[%s615_s1 + $0x22] sm:$0xff] %vm234_vm3, %v193_v46 }
  0xc1   :  { %v146_v47 = vpop.permute.xlu1 %145  ;;  %v144_v48 = vpop.permute.xlu0 %143 }
  0xc2   :  { %182 = vst.msk [vmem:[%s615_s1 + $0x92] sm:$0xff] %vm169_vm2, %v146_v47  ;;  %v199_v49 = vpop.permute.xlu2 %198 }
  0xc3   :  { %181 = vst.msk [vmem:[%s615_s1 + $0x82] sm:$0xff] %vm169_vm2, %v144_v48 }
  0xc4   :  { %241 = vst.msk [vmem:[%s615_s1 + $0x4a] sm:$0xff] %vm234_vm3, %v199_v49 }
  0xc9   :  { %v152_v50 = vpop.permute.xlu1 %151  ;;  %v150_v51 = vpop.permute.xlu0 %149 }
  0xca   :  { %185 = vst.msk [vmem:[%s615_s1 + $0xb2] sm:$0xff] %vm169_vm2, %v152_v50  ;;  %v205_v52 = vpop.permute.xlu2 %204 }
  0xcb   :  { %184 = vst.msk [vmem:[%s615_s1 + $0xaa] sm:$0xff] %vm169_vm2, %v150_v51 }
  0xcc   :  { %244 = vst.msk [vmem:[%s615_s1 + $0x6a] sm:$0xff] %vm234_vm3, %v205_v52 }
  0xd1   :  { %v191_v53 = vpop.permute.xlu1 %190  ;;  %v189_v54 = vpop.permute.xlu0 %188 }
  0xd2   :  { %237 = vst.msk [vmem:[%s615_s1 + $0x1a] sm:$0xff] %vm234_vm3, %v191_v53  ;;  %v211_v55 = vpop.permute.xlu2 %210 }
  0xd3   :  { %236 = vst.msk [vmem:[%s615_s1 + $0xa] sm:$0xff] %vm234_vm3, %v189_v54 }
  0xd4   :  { %247 = vst.msk [vmem:[%s615_s1 + $0x92] sm:$0xff] %vm234_vm3, %v211_v55 }
  0xd9   :  { %v197_v56 = vpop.permute.xlu1 %196  ;;  %v195_v57 = vpop.permute.xlu0 %194 }
  0xda   :  { %240 = vst.msk [vmem:[%s615_s1 + $0x3a] sm:$0xff] %vm234_vm3, %v197_v56  ;;  %v217_v58 = vpop.permute.xlu2 %216 }
  0xdb   :  { %239 = vst.msk [vmem:[%s615_s1 + $0x32] sm:$0xff] %vm234_vm3, %v195_v57 }
  0xdc   :  { %250 = vst.msk [vmem:[%s615_s1 + $0xb2] sm:$0xff] %vm234_vm3, %v217_v58 }
  0xe1   :  { %v203_v59 = vpop.permute.xlu1 %202  ;;  %v201_v60 = vpop.permute.xlu0 %200 }
  0xe2   :  { %243 = vst.msk [vmem:[%s615_s1 + $0x62] sm:$0xff] %vm234_vm3, %v203_v59 }
  0xe3   :  { %242 = vst.msk [vmem:[%s615_s1 + $0x52] sm:$0xff] %vm234_vm3, %v201_v60 }
  0xe9   :  { %v209_v61 = vpop.permute.xlu1 %208  ;;  %v207_v62 = vpop.permute.xlu0 %206 }
  0xea   :  { %246 = vst.msk [vmem:[%s615_s1 + $0x82] sm:$0xff] %vm234_vm3, %v209_v61 }
  0xeb   :  { %245 = vst.msk [vmem:[%s615_s1 + $0x7a] sm:$0xff] %vm234_vm3, %v207_v62 }
  0xf1   :  { %v215_v63 = vpop.permute.xlu1 %214  ;;  %v213_v0 = vpop.permute.xlu0 %212 }
  0xf2   :  { %249 = vst.msk [vmem:[%s615_s1 + $0xaa] sm:$0xff] %vm234_vm3, %v215_v63 }
  0xf3   :  { %248 = vst.msk [vmem:[%s615_s1 + $0x9a] sm:$0xff] %vm234_vm3, %v213_v0 }
  0xf4   :  { %272 = vsyncpa [#allocation3], 1 }

</bundles_post_ra>
